<compile_context>
chip_gen: v7x
topology: tpu7x:2x2x1
jax: 0.10.0
libtpu: 0.0.40
codegen_flags: <defaults>
</compile_context>

<pallas_src>
import jax
import jax.numpy as jnp
from jax import lax
from jax.experimental import pallas as pl
from jax.experimental.pallas import tpu as pltpu


_INV_SQRT2 = 0.70710678118654752


def _gelu_exact(x):
    # Matches torch.nn.functional.gelu default (exact, erf-based), in f32.
    return 0.5 * x * (1.0 + lax.erf(x * jnp.float32(_INV_SQRT2)))


def _ffn_kernel_direct(x_ref, w1_ref, b1_ref, w2_ref, b2_ref, o_ref):
    """float32 output: accumulate directly into the resident output block."""
    n = pl.program_id(1)

    @pl.when(n == 0)
    def _():
        # Fold the c_proj bias into the accumulator init.
        o_ref[...] = jnp.broadcast_to(
            b2_ref[...].astype(jnp.float32), o_ref.shape)

    # (tm, H) @ (H, tn) on the MXU (bf16 in, f32 accumulate).
    h = jnp.dot(x_ref[...], w1_ref[...], preferred_element_type=jnp.float32)
    h = _gelu_exact(h + b1_ref[...].astype(jnp.float32))
    # (tm, tn) @ (tn, H) accumulated into the resident f32 output tile.
    o_ref[...] += jnp.dot(h.astype(w2_ref.dtype), w2_ref[...],
                          preferred_element_type=jnp.float32)


def _ffn_kernel_scratch(x_ref, w1_ref, b1_ref, w2_ref, b2_ref, o_ref, acc_ref):
    """Narrow output dtype: accumulate in f32 scratch, cast on the last step."""
    n = pl.program_id(1)
    n_last = pl.num_programs(1) - 1

    @pl.when(n == 0)
    def _():
        acc_ref[...] = jnp.broadcast_to(
            b2_ref[...].astype(jnp.float32), acc_ref.shape)

    h = jnp.dot(x_ref[...], w1_ref[...], preferred_element_type=jnp.float32)
    h = _gelu_exact(h + b1_ref[...].astype(jnp.float32))
    acc_ref[...] += jnp.dot(h.astype(w2_ref.dtype), w2_ref[...],
                            preferred_element_type=jnp.float32)

    @pl.when(n == n_last)
    def _():
        o_ref[...] = acc_ref[...].astype(o_ref.dtype)


def _pick_tile(total, cap, align):
    """Largest multiple of `align` dividing `total`, <= cap.

    Falls back to the full extent (always a legal Pallas block dim)."""
    cap = min(cap, total)
    start = cap - (cap % align)
    for t in range(start, 0, -align):
        if total % t == 0:
            return t
    return total


def _device_vmem_bytes():
    try:
        return int(pltpu.get_tpu_info().vmem_capacity_bytes)
    except Exception:
        return 64 * 2**20   # conservative fallback: v7x per-TensorCore VMEM


def _vmem_estimate(tm, tn, H, cd_size, out_size, use_scratch):
    est = 0
    est += 2 * tm * H * cd_size       # x row-tile (double-buffered)
    est += 2 * H * tn * cd_size       # w1 column block
    est += 2 * tn * 4                 # b1 block (f32)
    est += 2 * tn * H * cd_size       # w2 row block
    est += 2 * H * 4                  # b2
    est += 2 * tm * H * out_size      # output tile
    if use_scratch:
        est += tm * H * 4             # f32 accumulator scratch
    return est


def feed_forward(x, w1, b1, w2, b2, *, compute_dtype=jnp.bfloat16,
                 tm=None, tn=None):
    """GPT FeedForward: gelu(x @ w1 + b1) @ w2 + b2 (dropout = eval-mode identity).

    x: [B, S, H]; w1: [H, 4H]; b1: [4H]; w2: [4H, H]; b2: [H].
    """
    B, S, H = x.shape
    H4 = w1.shape[1]
    M = B * S

    out_dtype = x.dtype
    cd_size = jnp.dtype(compute_dtype).itemsize
    out_size = jnp.dtype(out_dtype).itemsize
    use_scratch = out_dtype != jnp.float32
    row_align = 8 if cd_size >= 4 else 16

    # Generation-aware VMEM budget (v7x: 64 MiB per TC; v5e/v6e: 128 MiB).
    device_vmem = _device_vmem_bytes()
    headroom = 2 * 2**20                       # compiler-internal scratch
    budget = int(0.85 * device_vmem) - headroom

    if tm is None or tn is None:
        sel_tm = _pick_tile(M, row_align, row_align)
        sel_tn = _pick_tile(H4, 128, 128)
        done = False
        # Prefer large tm (weight-reuse / arithmetic intensity), then the
        # largest tn (>=256 fills the 256-deep MXUs) that fits the budget.
        for tm_cap in (512, 384, 256, 128, 64, 32, 16, 8):
            if tm_cap < row_align and tm_cap < M:
                continue
            cand_tm = _pick_tile(M, tm_cap, row_align)
            for tn_cap in (512, 384, 256, 128):
                cand_tn = _pick_tile(H4, tn_cap, 128)
                if _vmem_estimate(cand_tm, cand_tn, H, cd_size, out_size,
                                  use_scratch) <= budget:
                    sel_tm, sel_tn = cand_tm, cand_tn
                    done = True
                    break
            if done:
                break
        if tm is None:
            tm = sel_tm
        if tn is None:
            tn = sel_tn

    # Make sure a large-M "parallel" axis has >= 2 steps (v7x: 2 TensorCores).
    if M // tm < 2 and M >= 512:
        half = _pick_tile(M, M // 2, row_align)
        if half < M and _vmem_estimate(half, tn, H, cd_size, out_size,
                                       use_scratch) <= budget:
            tm = half

    assert M % tm == 0 and H4 % tn == 0

    grid_m = M // tm
    grid_n = H4 // tn

    # Feed the MXU bf16 (f32 accumulation is set in-kernel); biases stay f32.
    x2 = x.reshape(M, H).astype(compute_dtype)
    w1c = w1.astype(compute_dtype)
    w2c = w2.astype(compute_dtype)
    b1_2 = b1.astype(jnp.float32).reshape(1, H4)
    b2_2 = b2.astype(jnp.float32).reshape(1, H)

    vmem_est = _vmem_estimate(tm, tn, H, cd_size, out_size, use_scratch)
    vmem_limit_bytes = int(min(max(vmem_est + headroom, 16 * 2**20),
                               int(0.9 * device_vmem)))

    w_bytes = grid_m * (H * H4 + H4 * H) * cd_size + grid_m * (H4 + H) * 4
    cost = pl.CostEstimate(
        flops=4 * M * H * H4,                   # two matmuls, 2 flops/MAC
        transcendentals=M * H4,                 # erf per intermediate element
        bytes_accessed=M * H * cd_size + M * H * out_size + w_bytes,
    )

    kernel = _ffn_kernel_scratch if use_scratch else _ffn_kernel_direct
    scratch_shapes = [pltpu.VMEM((tm, H), jnp.float32)] if use_scratch else []

    out2 = pl.pallas_call(
        kernel,
        out_shape=jax.ShapeDtypeStruct((M, H), out_dtype),
        grid_spec=pltpu.PrefetchScalarGridSpec(
            num_scalar_prefetch=0,
            grid=(grid_m, grid_n),
            in_specs=[
                pl.BlockSpec((tm, H), lambda i, n: (i, 0)),   # x row-tile
                pl.BlockSpec((H, tn), lambda i, n: (0, n)),   # w1 column block
                pl.BlockSpec((1, tn), lambda i, n: (0, n)),   # b1 block
                pl.BlockSpec((tn, H), lambda i, n: (n, 0)),   # w2 row block
                pl.BlockSpec((1, H), lambda i, n: (0, 0)),    # b2
            ],
            out_specs=pl.BlockSpec((tm, H), lambda i, n: (i, 0)),
            scratch_shapes=scratch_shapes,
        ),
        compiler_params=pltpu.CompilerParams(
            dimension_semantics=("parallel", "arbitrary"),
            vmem_limit_bytes=vmem_limit_bytes,
        ),
        cost_estimate=cost,
    )(x2, w1c, b1_2, w2c, b2_2)

    return out2.reshape(B, S, H)


def feed_forward_ref(x, w1, b1, w2, b2, compute_dtype=jnp.bfloat16):
    """Pure-JAX reference with the same bf16-matmul / f32-accumulate casts."""
    xc = x.astype(compute_dtype)
    h = jnp.dot(xc, w1.astype(compute_dtype),
                preferred_element_type=jnp.float32)
    h = _gelu_exact(h + b1.astype(jnp.float32))
    out = jnp.dot(h.astype(compute_dtype), w2.astype(compute_dtype),
                  preferred_element_type=jnp.float32)
    out = out + b2.astype(jnp.float32)
    return out.astype(x.dtype)


if __name__ == "__main__":
    B, S, H = 2, 8, 32
    H4 = 4 * H

    key = jax.random.PRNGKey(0)
    kx, kw1, kb1, kw2, kb2 = jax.random.split(key, 5)

    x = jax.random.normal(kx, (B, S, H), dtype=jnp.float32)
    # Deterministic "init": roughly nn.Linear's uniform(-1/sqrt(fan_in), ...)
    w1 = jax.random.uniform(kw1, (H, H4), jnp.float32, -1.0, 1.0) / jnp.sqrt(H)
    b1 = jax.random.uniform(kb1, (H4,), jnp.float32, -1.0, 1.0) / jnp.sqrt(H)
    w2 = jax.random.uniform(kw2, (H4, H), jnp.float32, -1.0, 1.0) / jnp.sqrt(H4)
    b2 = jax.random.uniform(kb2, (H,), jnp.float32, -1.0, 1.0) / jnp.sqrt(H4)

    out = feed_forward(x, w1, b1, w2, b2)
    out = jax.block_until_ready(out)

    ref = feed_forward_ref(x, w1, b1, w2, b2)
    assert out.shape == (B, S, H)
    assert jnp.allclose(out, ref, atol=2e-3, rtol=2e-3), "mismatch vs reference"

    print("KERNEL_OK")
</pallas_src>

<mosaic_0001>
module attributes {stable_mosaic.version = 11 : i64} {
  func.func @_ffn_kernel_direct(%arg0: i32, %arg1: i32, %arg2: memref<16x32xbf16, #tpu.memory_space<vmem>>, %arg3: memref<32x128xbf16, #tpu.memory_space<vmem>>, %arg4: memref<1x128xf32, #tpu.memory_space<vmem>>, %arg5: memref<128x32xbf16, #tpu.memory_space<vmem>>, %arg6: memref<1x32xf32, #tpu.memory_space<vmem>>, %arg7: memref<16x32xf32, #tpu.memory_space<vmem>>) attributes {dimension_semantics = [#tpu.dimension_semantics<parallel>, #tpu.dimension_semantics<arbitrary>], iteration_bounds = array<i64: 1, 1>, scalar_prefetch = 0 : i64, scratch_operands = 0 : i64, tpu.core_type = #tpu.core_type<tc>, window_params = [{transform_indices = @transform_0, window_bounds = array<i64: 16, 32>}, {transform_indices = @transform_1, window_bounds = array<i64: 32, 128>}, {transform_indices = @transform_2, window_bounds = array<i64: 1, 128>}, {transform_indices = @transform_3, window_bounds = array<i64: 128, 32>}, {pipeline_mode = #tpu.pipeline_mode<synchronous>, transform_indices = @transform_4, window_bounds = array<i64: 1, 32>}, {transform_indices = @transform_5, window_bounds = array<i64: 16, 32>}]} {
    %c0_i32 = arith.constant 0 : i32
    %0 = arith.cmpi eq, %arg1, %c0_i32 : i32
    %1 = arith.extui %0 : i1 to i32
    %c0_i32_0 = arith.constant 0 : i32
    %2 = arith.cmpi ne, %1, %c0_i32_0 : i32
    scf.if %2 {
      %c0_16 = arith.constant 0 : index
      %c0_17 = arith.constant 0 : index
      %23 = vector.load %arg6[%c0_16, %c0_17] : memref<1x32xf32, #tpu.memory_space<vmem>>, vector<1x32xf32>
      %24 = vector.shape_cast %23 : vector<1x32xf32> to vector<1x32xf32>
      %25 = vector.broadcast %24 : vector<1x32xf32> to vector<16x32xf32>
      %c0_18 = arith.constant 0 : index
      %c0_19 = arith.constant 0 : index
      %26 = vector.load %arg7[%c0_18, %c0_19] : memref<16x32xf32, #tpu.memory_space<vmem>>, vector<16x32xf32>
      tpu.vector_store %arg7[%c0_18, %c0_19], %25 {strides = array<i32>} : memref<16x32xf32, #tpu.memory_space<vmem>>, vector<16x32xf32>,
    } else {
    }
    %c0 = arith.constant 0 : index
    %c0_1 = arith.constant 0 : index
    %3 = vector.load %arg2[%c0, %c0_1] : memref<16x32xbf16, #tpu.memory_space<vmem>>, vector<16x32xbf16>
    %c0_2 = arith.constant 0 : index
    %c0_3 = arith.constant 0 : index
    %4 = vector.load %arg3[%c0_2, %c0_3] : memref<32x128xbf16, #tpu.memory_space<vmem>>, vector<32x128xbf16>
    %cst = arith.constant dense<0.000000e+00> : vector<16x128xf32>
    %5 = tpu.matmul %3, %4, %cst {dimension_numbers = #tpu.dot_dimension_numbers<[1], [0], [0], [1], [0, 0, 1, 1], [], []>} : vector<16x32xbf16>, vector<32x128xbf16>, vector<16x128xf32> -> vector<16x128xf32>
    %c0_4 = arith.constant 0 : index
    %c0_5 = arith.constant 0 : index
    %6 = vector.load %arg4[%c0_4, %c0_5] : memref<1x128xf32, #tpu.memory_space<vmem>>, vector<1x128xf32>
    %7 = vector.broadcast %6 : vector<1x128xf32> to vector<16x128xf32>
    %8 = arith.addf %5, %7 : vector<16x128xf32>
    %cst_6 = arith.constant 5.000000e-01 : f32
    %9 = vector.broadcast %cst_6 : f32 to vector<16x128xf32>
    %10 = arith.mulf %9, %8 : vector<16x128xf32>
    %cst_7 = arith.constant 0.707106769 : f32
    %11 = vector.broadcast %cst_7 : f32 to vector<16x128xf32>
    %12 = arith.mulf %8, %11 : vector<16x128xf32>
    %13 = math.erf %12 : vector<16x128xf32>
    %cst_8 = arith.constant 1.000000e+00 : f32
    %14 = vector.broadcast %cst_8 : f32 to vector<16x128xf32>
    %15 = arith.addf %14, %13 : vector<16x128xf32>
    %16 = arith.mulf %10, %15 : vector<16x128xf32>
    %c0_9 = arith.constant 0 : index
    %c0_10 = arith.constant 0 : index
    %17 = vector.load %arg7[%c0_9, %c0_10] : memref<16x32xf32, #tpu.memory_space<vmem>>, vector<16x32xf32>
    %18 = arith.truncf %16 : vector<16x128xf32> to vector<16x128xbf16>
    %c0_11 = arith.constant 0 : index
    %c0_12 = arith.constant 0 : index
    %19 = vector.load %arg5[%c0_11, %c0_12] : memref<128x32xbf16, #tpu.memory_space<vmem>>, vector<128x32xbf16>
    %cst_13 = arith.constant dense<0.000000e+00> : vector<16x32xf32>
    %20 = tpu.matmul %18, %19, %cst_13 {dimension_numbers = #tpu.dot_dimension_numbers<[1], [0], [0], [1], [0, 0, 1, 1], [], []>} : vector<16x128xbf16>, vector<128x32xbf16>, vector<16x32xf32> -> vector<16x32xf32>
    %21 = arith.addf %17, %20 : vector<16x32xf32>
    %c0_14 = arith.constant 0 : index
    %c0_15 = arith.constant 0 : index
    %22 = vector.load %arg7[%c0_14, %c0_15] : memref<16x32xf32, #tpu.memory_space<vmem>>, vector<16x32xf32>
    tpu.vector_store %arg7[%c0_14, %c0_15], %21 {strides = array<i32>} : memref<16x32xf32, #tpu.memory_space<vmem>>, vector<16x32xf32>,
    return
  }
  func.func @transform_0(%arg0: i32, %arg1: i32) -> (i32, i32) {
    %c0_i32 = arith.constant 0 : i32
    %c0_i32_0 = arith.constant 0 : i32
    return %arg0, %c0_i32 : i32, i32
  }
  func.func @transform_1(%arg0: i32, %arg1: i32) -> (i32, i32) {
    %c0_i32 = arith.constant 0 : i32
    %c0_i32_0 = arith.constant 0 : i32
    return %c0_i32, %arg1 : i32, i32
  }
  func.func @transform_2(%arg0: i32, %arg1: i32) -> (i32, i32) {
    %c0_i32 = arith.constant 0 : i32
    %c0_i32_0 = arith.constant 0 : i32
    return %c0_i32, %arg1 : i32, i32
  }
  func.func @transform_3(%arg0: i32, %arg1: i32) -> (i32, i32) {
    %c0_i32 = arith.constant 0 : i32
    %c0_i32_0 = arith.constant 0 : i32
    return %arg1, %c0_i32 : i32, i32
  }
  func.func @transform_4(%arg0: i32, %arg1: i32) -> (i32, i32) {
    %c0_i32 = arith.constant 0 : i32
    %c0_i32_0 = arith.constant 0 : i32
    %c0_i32_1 = arith.constant 0 : i32
    return %c0_i32, %c0_i32_0 : i32, i32
  }
  func.func @transform_5(%arg0: i32, %arg1: i32) -> (i32, i32) {
    %c0_i32 = arith.constant 0 : i32
    %c0_i32_0 = arith.constant 0 : i32
    return %arg0, %c0_i32 : i32, i32
  }
}

</mosaic_0001>

<bundles_post_ra>
// kernel: tpu_custom_call.1
= control target key start
LH: loop header
LB: loop body
LE: loop exit
PB: predicated region body
PF: predicated region fallthrough
CT: control target
= control target key end

     0   :  { %v347_v1 = vmov 0.0   ;;  %vm348_vm0 = vmmov 0   ;;  %vm33_vm1 = vcmask 261120   ;;  %s438_s0 = inlined_call_operand.vmem [shape: bf16[16,32], index: 0, kind: input, shape index: {}]   ;;  %s439_s1 = inlined_call_operand.vmem [shape: bf16[32,128], index: 1, kind: input, shape index: {}]   ;;  %s440_s2 = inlined_call_operand.vmem [shape: f32[1,128], index: 2, kind: input, shape index: {}]   ;;  %s441_s3 = inlined_call_operand.vmem [shape: bf16[128,32], index: 3, kind: input, shape index: {}]   ;;  %s442_s4 = inlined_call_operand.vmem [shape: f32[1,32], index: 4, kind: input, shape index: {}]   ;;  %s443_s5 = inlined_call_operand.hbm [shape: f32[16,32], index: 5, kind: output, shape index: {}]  }
   0x1   :  { %v308_v0 = vld [vmem:[%s439_s1] sm:$0xff]   ;;  %275 = vmatprep.subr.bf16.mxu0 %v347_v1  ;;  %283 = vmatprep.subr.bf16.mxu1 %v347_v1  ;;  %v309_v2 = vld [vmem:[%s439_s1 + $0x8] sm:$0xff]  }
   0x2   :  { %276 = vmatpush3.bf16.msra.mxu0 %v308_v0  ;;  %279 = vmatprep.mubr.msk.bf16.mxu0 %vm348_vm0, %v347_v1  ;;  %v311_v3 = vld [vmem:[%s441_s3] sm:$0xff]   ;;  %v312_v5 = vld [vmem:[%s441_s3 + $0x8] sm:$0xff]  }
   0x3   :  { %277 = vmatprep.subr.bf16.mxu0 %v347_v1  ;;  %299 = vmatprep.mubr.msk.bf16.mxu1 %vm348_vm0, %v347_v1  ;;  %v310_v4 = vld [vmem:[%s438_s0] sm:$0xff]  }
   0x4   :  { %284 = vmatpush3.bf16.msra.mxu1 %v311_v3 }
   0x5   :  { %285 = vmatprep.subr.bf16.mxu1 %v347_v1 }
   0x6   :  { %278 = vmatpush3.bf16.msra.mxu0 %v309_v2 }
   0x8   :  { %286 = vmatpush3.bf16.msra.mxu1 %v312_v5 }
   0x9   :  { %280 = vmatmul.mubr.msk.bf16.vlgmr.msra.gmra.mrb[0].mxu0 %vm33_vm1, %v310_v4 }
   0xa   :  { %10 = vsyncpa [#allocation3], 0  ;;  %287 = vmatprep.subr.bf16.mxu1 %v347_v1  ;;  %v313_v6 = vld [vmem:[%s441_s3 + $0x10] sm:$0xff]   ;;  %v314_v7 = vld [vmem:[%s441_s3 + $0x18] sm:$0xff]  }
   0xb   :  { %v315_v8 = vld [vmem:[%s441_s3 + $0x20] sm:$0xff]   ;;  %v316_v9 = vld [vmem:[%s441_s3 + $0x28] sm:$0xff]   ;;  %v317_v10 = vld [vmem:[%s441_s3 + $0x30] sm:$0xff]  }
   0xc   :  { %288 = vmatpush3.bf16.msra.mxu1 %v313_v6  ;;  %v318_v11 = vld [vmem:[%s441_s3 + $0x38] sm:$0xff]   ;;  %v249_v12 = vld [vmem:[%s442_s4] ss:$0 sm:$0xff] }
   0xd   :  { %289 = vmatprep.subr.bf16.mxu1 %v347_v1  ;;  %34 = vst.msk [vmem:[#allocation2] sm:$0xff] %vm33_vm1, %v249_v12  ;;  %35 = vst.msk [vmem:[#allocation2 + $0x8] sm:$0xff] %vm33_vm1, %v249_v12  ;;  %v250_v13 = vld [vmem:[%s440_s2] ss:$0 sm:$0xff]  ;;  %s349_s2 = smov [#allocation2]  }
   0xe   :  { %s238_s3 = sshll.u32 %s349_s2, 4  ;;  %s239_s3 = int_to_ptr.vmem [resolvable:$true] %s238_s3 }
   0xf   :  { %s323_s4 = scalar_lea.vmem %s239_s3, 256  ;;  %p328_p1 = scmp.lt.s32.totalorder %s239_s3, %s239_s3 }
  0x10   :  { %290 = vmatpush3.bf16.msra.mxu1 %v314_v7  ;;  %p324_p0 = scmp.ne.s32.totalorder %s239_s3, %s323_s4  ;;  %p329_p2 = scmp.lt.s32.totalorder %s323_s4, %s323_s4 }
  0x11   :  { %291 = vmatprep.subr.bf16.mxu1 %v347_v1 }
  0x12   :  { %p330_p3 = por %p329_p2, %p328_p1 }
  0x14   :  { %292 = vmatpush3.bf16.msra.mxu1 %v315_v8  ;;  %v121_v31 = vld [vmem:[#allocation2] sm:$0xff]  ;;  %v122_v33 = vld [vmem:[#allocation2 + $0x8] sm:$0xff]  ;;  %p331_p4 = pnand %p330_p3, %p324_p0 }
  0x15   :  { %293 = vmatprep.subr.bf16.mxu1 %v347_v1 }
  0x18   :  { %294 = vmatpush3.bf16.msra.mxu1 %v316_v9 }
  0x19   :  { %295 = vmatprep.subr.bf16.mxu1 %v347_v1 }
  0x1c   :  { %296 = vmatpush3.bf16.msra.mxu1 %v317_v10 }
  0x1d   :  { %297 = vmatprep.subr.bf16.mxu1 %v347_v1 }
  0x20   :  { %298 = vmatpush3.bf16.msra.mxu1 %v318_v11 }
  0xdc   :  { %v104_v14 = vpop.f32.mrb[0].mxu0 }
  0xdd   :  { %v105_v15 = vadd.f32 %v250_v13, %v104_v14  ;;  %v281_v16 = vpop.f32.mrb[1].mxu0 }
  0xde   :  { %v107_v17 = vpop.f32.mrb[2].mxu0 }
  0xdf   :  { %v113_v18 = vmul.f32 0.70710677, %v105_v15  ;;  %v108_v19 = vadd.f32 %v250_v13, %v107_v17  ;;  %v282_v20 = vpop.f32.mrb[3].mxu0  ;;  %v111_v25 = vmul.f32 0.5, %v105_v15 }
  0xe1   :  { %319 = verf.f32 %v113_v18  ;;  %v114_v21 = vmul.f32 0.70710677, %v108_v19  ;;  %v112_v26 = vmul.f32 0.5, %v108_v19 }
  0xe3   :  { %321 = verf.f32 %v114_v21 }
  0xeb   :  { %v320_v22 = vpop.eup %319 }
  0xec   :  { %v117_v23 = vadd.f32 1.0, %v320_v22 }
  0xed   :  { %v322_v24 = vpop.eup %321 }
  0xee   :  { %v118_v27 = vadd.f32 1.0, %v322_v24  ;;  %v119_v28 = vmul.f32 %v117_v23, %v111_v25 }
  0xf0   :  { %v120_v29 = vmul.f32 %v118_v27, %v112_v26 }
  0xf2   :  { %v123_v30 = vpack.c.bf16 %v120_v29, %v119_v28 }
  0xf4   :  { %300 = vmatmul.mubr.bf16.vlgmr.msra.gmra.mrb[0].mxu1 %v123_v30 }
 0x1c7   :  { %v222_v32 = vpop.f32.mrb[0].mxu1 }
 0x1c8   :  { %v229_v34 = vadd.f32 %v222_v32, %v121_v31  ;;  %v301_v35 = vpop.f32.mrb[1].mxu1 }
 0x1c9   :  { %v225_v36 = vpop.f32.mrb[2].mxu1 }
 0x1ca   :  { %231 = vst.msk [vmem:[#allocation2] sm:$0xff] %vm33_vm1, %v229_v34  ;;  %v230_v37 = vadd.f32 %v225_v36, %v122_v33  ;;  %v302_v38 = vpop.f32.mrb[3].mxu1 }
 0x1cc   :  { %232 = vst.msk [vmem:[#allocation2 + $0x8] sm:$0xff] %vm33_vm1, %v230_v37 }
 0x1cd   :  { %334 = shalt.err (!%p331_p4)
}
 0x1ce   :  { %s335_s19 = scalar_lea.hbm %s443_s5, 256 }
 0x1cf   :  { %p336_p5 = scmp.ne.s32.totalorder %s443_s5, %s335_s19  ;;  %p339_p6 = scmp.lt.u32.totalorder %s335_s19, %s443_s5 }
 0x1d1   :  { %p341_p7 = pnand %p339_p6, %p336_p5 }
 0x1d3   :  { %344 = shalt.err (!%p341_p7)
}
 0x1d4   :  { %s350_s24 = smov 128   ;;  %s351_s25 = smov 8  }
 0x1d5   :  { %244 = dma.vmem_to_hbm [thread:$0]  %s239_s3, 256, %s443_s5, [#allocation3], %s350_s24, %s350_s24, %s351_s25  }
 0x1d6   :  { %345 = dma.done.wait [#allocation3], 256  }
 0x1d7   :  { %346 = vsyncadd [#allocation3], 4294967040 }
 0x1d8   :  { %248 = vsyncpa [#allocation3], 1 }

</bundles_post_ra>
